<compile_context>
chip_gen: v7x
topology: tpu7x:2x2x1
jax: 0.10.0
libtpu: 0.0.40
codegen_flags: <defaults>
</compile_context>

<pallas_src>
import functools

import jax
import jax.numpy as jnp
from jax import lax
from jax.experimental import pallas as pl
from jax.experimental.pallas import tpu as pltpu


def _rmsnorm_ane_kernel(x_ref, w_ref, o_ref, *, eps):
    # x_ref: (C, T) tile; w_ref: (C, 1) per-channel scale (grid-invariant).
    x = x_ref[...].astype(jnp.float32)                 # (C, T)
    var = jnp.mean(x * x, axis=0, keepdims=True)       # (1, T): mean over channels
    y = x * lax.rsqrt(var + eps)                       # rsqrt rides the EUP slot
    o_ref[...] = (w_ref[...].astype(jnp.float32) * y).astype(o_ref.dtype)


def _choose_lane_tile(n_lane, n_batch, C, in_isz, out_isz, w_isz,
                      target_bytes=8 << 20, vmem_budget=48 << 20):
    """Pick the lane-axis tile T (a multiple of 128, or the full lane extent).

    - ~target_bytes input blocks amortize the fixed per-grid-step overhead
      (matters most on v7x's ~3.2 TB/s HBM; harmless on v5e/v6e).
    - Double-buffered in+out blocks plus the (double-buffered, lane-padded)
      (C, 1) weight block must fit vmem_budget, sized for v7x's 64 MiB VMEM
      (v5e/v6e have 128 MiB, so the same budget is safe there too).
    - When n_batch == 1, split the lane axis into >=2 tiles so the grid has
      at least two "parallel" steps for v7x's two TensorCores.
    """
    per_lane = C * (in_isz + out_isz)          # in+out bytes per lane column
    w_bytes = 2 * C * 128 * w_isz              # double-buffered, lane-padded weight
    avail = vmem_budget - w_bytes - (2 << 20)  # slack for compiler scratch
    if avail < 2 * 128 * per_lane:
        # TODO(synk): add a C-chunked two-pass variant (reduction grid axis
        # marked "arbitrary" with a (1, T) partial-sum scratch) for huge C.
        raise ValueError(
            f"hidden_size={C} is too large to keep a full-channel block "
            f"resident within the {vmem_budget >> 20} MiB VMEM budget "
            f"(v7x has 64 MiB VMEM); a C-chunked variant is required.")
    max_ts = (avail // (2 * per_lane)) // 128 * 128          # VMEM cap
    ts = (target_bytes // max(1, C * in_isz)) // 128 * 128   # overhead target
    ts = max(128, min(ts, max_ts, 4096))
    if n_lane <= ts:
        if n_batch == 1 and n_lane >= 256:
            # Guarantee >=2 parallel grid steps (2 TensorCores on v7x).
            return max(128, (n_lane // 2) // 128 * 128)
        return n_lane                         # full lane extent: always legal
    return ts                                 # multiple of 128; ragged tail ok


def _vmem_limit(C, ts, in_isz, out_isz, w_isz):
    blk = 2 * C * ts * (in_isz + out_isz)     # double-buffered in+out blocks
    wblk = 2 * C * 128 * w_isz                # double-buffered lane-padded weight
    # NOTE: pl.Buffered(1) on the weight spec would reclaim half of wblk on
    # v7x; skipped here to keep the lowering maximally portable.
    return int(max(blk + wblk + (2 << 20), 32 << 20))


def rmsnorm_ane(x, weight, eps=1e-6, *, out_dtype=None, lane_tile=None):
    """x: (B, C, 1, S) in BC1S layout, weight: (C,).  Returns (B, C, 1, S).

    out_dtype defaults to x.dtype (bandwidth-optimal); pass
    out_dtype=jnp.float32 for strict parity with the PyTorch module's f32
    promotion when x is not already float32.
    """
    B, C, one, S = x.shape
    assert one == 1, "expected BC1S layout with singleton 3rd dim"
    assert weight.shape == (C,)
    in_dt = jnp.dtype(x.dtype)
    out_dt = jnp.dtype(x.dtype if out_dtype is None else out_dtype)
    w_dt = jnp.dtype(weight.dtype)

    x3 = x.reshape(B, C, S)      # drop the singleton axis; no data movement
    w2 = weight.reshape(C, 1)
    ts = lane_tile if lane_tile is not None else _choose_lane_tile(
        S, B, C, in_dt.itemsize, out_dt.itemsize, w_dt.itemsize)
    kern = functools.partial(_rmsnorm_ane_kernel, eps=eps)

    out = pl.pallas_call(
        kern,
        out_shape=jax.ShapeDtypeStruct((B, C, S), out_dt),
        grid=(B, pl.cdiv(S, ts)),
        in_specs=[
            pl.BlockSpec((None, C, ts), lambda b, s: (b, 0, s)),
            pl.BlockSpec((C, 1), lambda b, s: (0, 0)),
        ],
        out_specs=pl.BlockSpec((None, C, ts), lambda b, s: (b, 0, s)),
        compiler_params=pltpu.CompilerParams(
            dimension_semantics=("parallel", "parallel"),
            vmem_limit_bytes=_vmem_limit(
                C, ts, in_dt.itemsize, out_dt.itemsize, w_dt.itemsize)),
    )(x3, w2)
    return out.reshape(B, C, 1, S)


def rmsnorm_ane_ref(x, weight, eps=1e-6, out_dtype=None):
    """Pure-JAX reference mirroring the PyTorch forward (rank-4 BC1S path)."""
    out_dt = x.dtype if out_dtype is None else out_dtype
    xf = x.astype(jnp.float32)
    var = jnp.mean(xf * xf, axis=1, keepdims=True)
    y = xf * lax.rsqrt(var + eps)
    w = weight.astype(jnp.float32).reshape(1, -1, 1, 1)
    return (w * y).astype(out_dt)


if __name__ == "__main__":
    key = jax.random.PRNGKey(0)
    cases = [
        # (B, C=hidden, S, lane_tile, dtype)
        (2, 32, 8, None, jnp.float32),      # toy BC1S decode-ish shape (S < 128)
        (2, 64, 320, 128, jnp.float32),     # explicit tile with a ragged tail
        (1, 100, 512, None, jnp.float32),   # B=1 -> lane axis split for 2 TCs
        (2, 48, 256, None, jnp.bfloat16),   # bf16 in / bf16 out fast path
    ]
    for i, (B, C, S, lt, dt) in enumerate(cases):
        key, xk, wk = jax.random.split(key, 3)
        x = jax.random.normal(xk, (B, C, 1, S), dtype=jnp.float32).astype(dt)
        if i == 0:
            # Matches nn.Parameter(torch.ones(hidden_size)) init.
            weight = jnp.ones((C,), dtype=jnp.float32)
        else:
            weight = jax.random.normal(wk, (C,), dtype=jnp.float32)
        out = jax.block_until_ready(rmsnorm_ane(x, weight, lane_tile=lt))
        ref = rmsnorm_ane_ref(x, weight)
        assert out.shape == (B, C, 1, S), f"case {i}: bad shape {out.shape}"
        tol = 1e-4 if dt == jnp.float32 else 2e-2
        assert jnp.allclose(out.astype(jnp.float32), ref.astype(jnp.float32),
                            atol=tol, rtol=tol), f"case {i}: mismatch"
    print("KERNEL_OK")
</pallas_src>

<mosaic_0001>
module attributes {stable_mosaic.version = 11 : i64} {
  func.func @_rmsnorm_ane_kernel(%arg0: i32, %arg1: i32, %arg2: memref<1x32x8xf32, #tpu.memory_space<vmem>>, %arg3: memref<32x1xf32, #tpu.memory_space<vmem>>, %arg4: memref<1x32x8xf32, #tpu.memory_space<vmem>>) attributes {dimension_semantics = [#tpu.dimension_semantics<parallel>, #tpu.dimension_semantics<parallel>], iteration_bounds = array<i64: 2, 1>, scalar_prefetch = 0 : i64, scratch_operands = 0 : i64, tpu.core_type = #tpu.core_type<tc>, window_params = [{transform_indices = @transform_0, window_bounds = array<i64: 1, 32, 8>}, {pipeline_mode = #tpu.pipeline_mode<synchronous>, transform_indices = @transform_1, window_bounds = array<i64: 32, 1>}, {transform_indices = @transform_2, window_bounds = array<i64: 1, 32, 8>}]} {
    %c0 = arith.constant 0 : index
    %c0_0 = arith.constant 0 : index
    %c0_1 = arith.constant 0 : index
    %0 = vector.load %arg2[%c0, %c0_0, %c0_1] : memref<1x32x8xf32, #tpu.memory_space<vmem>>, vector<1x32x8xf32>
    %1 = vector.shape_cast %0 : vector<1x32x8xf32> to vector<32x8xf32>
    %2 = arith.mulf %1, %1 : vector<32x8xf32>
    %cst = arith.constant dense<0.000000e+00> : vector<8xf32>
    %3 = vector.multi_reduction <add>, %2, %cst [0] : vector<32x8xf32> to vector<8xf32>
    %4 = vector.shape_cast %3 : vector<8xf32> to vector<1x8xf32>
    %cst_2 = arith.constant 3.200000e+01 : f32
    %5 = vector.broadcast %cst_2 : f32 to vector<1x8xf32>
    %6 = arith.divf %4, %5 : vector<1x8xf32>
    %cst_3 = arith.constant 9.99999997E-7 : f32
    %7 = vector.broadcast %cst_3 : f32 to vector<1x8xf32>
    %8 = arith.addf %6, %7 : vector<1x8xf32>
    %9 = math.rsqrt %8 : vector<1x8xf32>
    %10 = vector.broadcast %9 : vector<1x8xf32> to vector<32x8xf32>
    %11 = arith.mulf %1, %10 : vector<32x8xf32>
    %c0_4 = arith.constant 0 : index
    %c0_5 = arith.constant 0 : index
    %12 = vector.load %arg3[%c0_4, %c0_5] : memref<32x1xf32, #tpu.memory_space<vmem>>, vector<32x1xf32>
    %13 = vector.broadcast %12 : vector<32x1xf32> to vector<32x8xf32>
    %14 = arith.mulf %13, %11 : vector<32x8xf32>
    %c0_6 = arith.constant 0 : index
    %c0_7 = arith.constant 0 : index
    %c0_8 = arith.constant 0 : index
    %15 = vector.load %arg4[%c0_6, %c0_7, %c0_8] : memref<1x32x8xf32, #tpu.memory_space<vmem>>, vector<1x32x8xf32>
    %16 = vector.shape_cast %15 : vector<1x32x8xf32> to vector<32x8xf32>
    %17 = vector.shape_cast %14 : vector<32x8xf32> to vector<1x32x8xf32>
    tpu.vector_store %arg4[%c0_6, %c0_7, %c0_8], %17 {strides = array<i32>} : memref<1x32x8xf32, #tpu.memory_space<vmem>>, vector<1x32x8xf32>,
    return
  }
  func.func @transform_0(%arg0: i32, %arg1: i32) -> (i32, i32, i32) {
    %c0_i32 = arith.constant 0 : i32
    %c0_i32_0 = arith.constant 0 : i32
    return %arg0, %c0_i32, %arg1 : i32, i32, i32
  }
  func.func @transform_1(%arg0: i32, %arg1: i32) -> (i32, i32) {
    %c0_i32 = arith.constant 0 : i32
    %c0_i32_0 = arith.constant 0 : i32
    %c0_i32_1 = arith.constant 0 : i32
    return %c0_i32, %c0_i32_0 : i32, i32
  }
  func.func @transform_2(%arg0: i32, %arg1: i32) -> (i32, i32, i32) {
    %c0_i32 = arith.constant 0 : i32
    %c0_i32_0 = arith.constant 0 : i32
    return %arg0, %c0_i32, %arg1 : i32, i32, i32
  }
}

</mosaic_0001>

<bundles_post_ra>
// kernel: tpu_custom_call.1
= control target key start
LH: loop header
LB: loop body
LE: loop exit
PB: predicated region body
PF: predicated region fallthrough
CT: control target
= control target key end

     0   :  { %s402_s9 = smov 0   ;;  %s404_s10 = smov 0   ;;  %s462_s0 = inlined_call_operand.vmem [shape: f32[2,32,8], index: 0, kind: input, shape index: {}]   ;;  %s463_s1 = inlined_call_operand.vmem [shape: f32[32,1], index: 1, kind: input, shape index: {}]   ;;  %s464_s2 = inlined_call_operand.vmem [shape: f32[2,32,8], index: 2, kind: output, shape index: {}]  }
   0x1   :  { %s406_s11 = smov 0  }
   0x2 LB: > { %s24_s12 = sadd.s32 1, %s380_s10  ;;  %p324_p0 = scmp.ge.s32.totalorder %s384_s11, 1  ;;  %s384_s11 = sphi %s406_s11, %s12_s11   ;;  %s380_s10 = sphi %s404_s10, %s466_s10   ;;  %s376_s9 = sphi %s402_s9, %s465_s9  }
   0x3   : > { %p26_p1 = scmp.ge.s32.totalorder %s24_s12, 2  ;;  %p131_p2 = scmp.lt.s32.totalorder %s384_s11, 3 }
   0x5   : > { %s468_s12 = smov (%p26_p1, %s24_s12), 0  ;;  %p132_p3 = pnand %p324_p0, %p131_p2 }
   0x6   : > { %v207_v0 = vld [vmem:[%s463_s1 + $0x10] sm:$0xff] (!%p132_p3)  ;;  %v205_v1 = vld [vmem:[%s463_s1] sm:$0xff] (!%p132_p3)  ;;  %v386_v2 = vmov (!%p132_p3), 0   ;;  %v208_v3 = vld [vmem:[%s463_s1 + $0x18] sm:$0xff] (!%p132_p3)  ;;  %p159_p4 = scmp.lt.s32.totalorder (!%p132_p3), %s376_s9, 1  ;;  %vm183_vm0 = vcmask (!%p132_p3), 64512  }
   0x7   : > { %135 = sbr.rel (%p132_p3) target bundleno = 143 (0x8f), region = 28  ;;  %359 = vset.pattern.permute.xlu1 (!%p132_p3), %v386_v2  ;;  %358 = vset.pattern.permute.xlu0 (!%p132_p3), %v386_v2  ;;  %v206_v4 = vld [vmem:[%s463_s1 + $0x8] sm:$0xff] (!%p132_p3) }
   0x8   : > { %221 = vperm.xlu1 (!%p132_p3), %359, %v207_v0   ;;  %211 = vperm.xlu0 (!%p132_p3), %358, %v205_v1  }
   0xc   : > { %226 = vperm.xlu1 (!%p132_p3), %359, %v208_v3   ;;  %216 = vperm.xlu0 (!%p132_p3), %358, %v206_v4  }
   0xe   : > { %s470_s9 = smov (!%p159_p4, %s376_s9), 1 }
   0xf   : > { %s331_s21 = sshll.u32 %s470_s9, 5 }
  0x10   : > { %s166_s24 = scalar_lea.vmem %s462_s0, %s331_s21  ;;  %s174_s27 = scalar_lea.vmem %s464_s2, %s331_s21 }
  0x11   : > { %v175_v5 = vld [vmem:[%s166_s24] sm:$0xff]  ;;  %v176_v6 = vld [vmem:[%s166_s24 + $0x8] sm:$0xff]  ;;  %v177_v9 = vld [vmem:[%s166_s24 + $0x10] sm:$0xff] }
  0x12   : > { %v179_v7 = vmul.f32 %v175_v5, %v175_v5  ;;  %v180_v8 = vmul.f32 %v176_v6, %v176_v6  ;;  %v181_v10 = vmul.f32 %v177_v9, %v177_v9  ;;  %v178_v13 = vld [vmem:[%s166_s24 + $0x18] sm:$0xff] }
  0x13   : > { %v182_v15 = vmul.f32 %v178_v13, %v178_v13 }
  0x14   : > { %v184_v11 = vsel %vm183_vm0, %v179_v7, 0.0  ;;  %v185_v12 = vsel %vm183_vm0, %v180_v8, 0.0  ;;  %v187_v16 = vsel %vm183_vm0, %v181_v10, 0.0 }
  0x15   : > { %v186_v14 = vadd.f32 %v185_v12, %v184_v11  ;;  %v189_v18 = vsel %vm183_vm0, %v182_v15, 0.0 }
  0x17   : > { %v188_v17 = vadd.f32 %v187_v16, %v186_v14 }
  0x19   : > { %v190_v19 = vadd.f32 %v189_v18, %v188_v17 }
  0x1b   : > { %v191_v20 = vrot.slane %v190_v19, 4 }
  0x1d   : > { %v192_v21 = vadd.f32 %v191_v20, %v190_v19 }
  0x1f   : > { %v193_v22 = vrot.slane %v192_v21, 2 }
  0x21   : > { %v194_v23 = vadd.f32 %v193_v22, %v192_v21 }
  0x23   : > { %v195_v24 = vrot.slane %v194_v23, 1 }
  0x25   : > { %v196_v25 = vadd.f32 %v195_v24, %v194_v23 }
  0x27   : > { %v198_v26 = vmul.f32 0.03125, %v196_v25 }
  0x29   : > { %v199_v27 = vadd.f32 1e-06, %v198_v26 }
  0x2b   : > { %360 = vrsqrt.f32 %v199_v27 }
  0x35   : > { %v361_v28 = vpop.eup %360 }
  0x36   : > { %v203_v29 = vmul.f32 %v361_v28, %v177_v9  ;;  %v201_v30 = vmul.f32 %v361_v28, %v175_v5  ;;  %v204_v35 = vmul.f32 %v361_v28, %v178_v13  ;;  %v202_v36 = vmul.f32 %v361_v28, %v176_v6 }
  0x87   : > { %v222_v31 = vpop.permute.xlu1 %221  ;;  %v212_v32 = vpop.permute.xlu0 %211 }
  0x88   : > { %v231_v33 = vmul.f32 %v222_v31, %v203_v29  ;;  %v229_v34 = vmul.f32 %v212_v32, %v201_v30 }
  0x8a   : > { %235 = vst.msk [vmem:[%s174_s27 + $0x10] sm:$0xff] %vm183_vm0, %v231_v33  ;;  %233 = vst.msk [vmem:[%s174_s27] sm:$0xff] %vm183_vm0, %v229_v34 }
  0x8b   : > { %v227_v37 = vpop.permute.xlu1 %226  ;;  %v217_v38 = vpop.permute.xlu0 %216 }
  0x8c   : > { %v232_v39 = vmul.f32 %v227_v37, %v204_v35  ;;  %v230_v40 = vmul.f32 %v217_v38, %v202_v36 }
  0x8e   : > { %236 = vst.msk [vmem:[%s174_s27 + $0x18] sm:$0xff] %vm183_vm0, %v232_v39  ;;  %234 = vst.msk [vmem:[%s174_s27 + $0x8] sm:$0xff] %vm183_vm0, %v230_v40 }
  0x8f PF: > { %s12_s11 = sadd.s32 1, %s384_s11   ;;  %s465_s9 = smov %s380_s10 }
  0x90   : > { %p9_p5 = scmp.ge.s32.totalorder %s12_s11, 4   ;;  %s466_s10 = smov %s468_s12 }
  0x92   :  { %11 = sbr.rel (!%p9_p5) target bundleno = 2 (0x2), region = 58 }

</bundles_post_ra>
